<compile_context>
chip_gen: v7x
topology: tpu7x:2x2x1
jax: 0.10.0
libtpu: 0.0.40
codegen_flags: <defaults>
</compile_context>

<pallas_src>
import jax
import jax.numpy as jnp
from jax.experimental import pallas as pl
from jax.experimental.pallas import tpu as pltpu

FEAT_DIM = 2048   # ResNet50 feature dim (module's feat_dim)
HIDDEN = 256      # first Linear of the replaced fc head
OUT_DIM = 10      # module's output_dim
OUT_PAD = 128     # lane-dense padded output width (real cols = first 10)


def _round_up(x, m):
    return (x + m - 1) // m * m


def head_kernel(feat_ref, w1_ref, b1_ref, w2_ref, b2_ref, o_ref):
    """feat_ref: [TB, 2048] bf16 pooled features; o_ref: [TB, OUT_PAD] f32 log-probs."""
    # Linear(2048, 256) (avgpool's 1/(H*W) already folded into w1) -> ReLU.
    # Dropout = identity (eval semantics).  bf16 MXU operands, f32 accumulation.
    h = jnp.dot(feat_ref[...], w1_ref[...],
                preferred_element_type=jnp.float32) + b1_ref[...]        # [TB, 256] f32
    h = jnp.maximum(h, 0.0)

    # Linear(256, 10), padded to 128 lanes; bf16 MXU path, padded W cols are 0.
    # Padded bias columns = -1e30 (added in f32, so no bf16 overflow).
    logits = jnp.dot(h.astype(jnp.bfloat16), w2_ref[...],
                     preferred_element_type=jnp.float32) + b2_ref[...]   # [TB, 128] f32

    # LogSoftmax(dim=1): padded columns contribute exp(-huge) == 0 to the sum.
    m = jnp.max(logits, axis=-1, keepdims=True)
    s = logits - m
    lse = jnp.log(jnp.sum(jnp.exp(s), axis=-1, keepdims=True))
    o_ref[...] = s - lse


def prepare_head_params(w1, b1, w2, b2, pool_hw):
    """One-time (load-time) weight prep: fold avgpool scale, cast to bf16, pad to 128 lanes.

    Runs OUTSIDE the per-call jitted forward so the ~3 MiB of weight reads/casts/pads are
    not repeated on every inference call.
    """
    w1p = (w1.astype(jnp.float32) * (1.0 / pool_hw)).astype(jnp.bfloat16)     # [2048, 256]
    b1p = b1.reshape(1, HIDDEN).astype(jnp.float32)                           # [1, 256]
    w2p = (jnp.zeros((HIDDEN, OUT_PAD), jnp.float32)
           .at[:, :OUT_DIM].set(w2.astype(jnp.float32))
           .astype(jnp.bfloat16))                                             # [256, 128]
    b2p = (jnp.full((1, OUT_PAD), -1e30, jnp.float32)
           .at[0, :OUT_DIM].set(b2.astype(jnp.float32)))                      # [1, 128]
    return w1p, b1p, w2p, b2p


@jax.jit
def model_head_forward(x_nchw, w1p, b1p, w2p, b2p):
    """x_nchw: [B, 2048, H, W] pre-pool feature map (NCHW). Returns [B, 10] log-probs."""
    B, C, H, W = x_nchw.shape
    assert C == FEAT_DIM

    # Global average pool: reduce the contiguous H*W last axis (lane-friendlier than
    # axis=(2,3) on NCHW if it does not fuse into the backbone producer).
    # 1/(H*W) is already folded into w1p, so a plain sum suffices.
    feat = jnp.sum(x_nchw.reshape(B, C, H * W).astype(jnp.float32),
                   axis=-1).astype(jnp.bfloat16)                              # [B, 2048]

    # Batch tiling: 16-aligned tiles (bf16 sublane packing), cap 512 rows; for B >= 32
    # force >= 2 tiles so the 'parallel' grid axis shards across both v7x TensorCores.
    if B >= 32:
        TB = min(512, _round_up(pl.cdiv(B, 2), 16))
    else:
        TB = _round_up(B, 16)
    Bpad = _round_up(B, TB)
    if Bpad != B:
        feat = jnp.pad(feat, ((0, Bpad - B), (0, 0)))

    cost = pl.CostEstimate(
        flops=2 * Bpad * FEAT_DIM * HIDDEN + 2 * Bpad * HIDDEN * OUT_PAD,
        transcendentals=Bpad * (OUT_PAD + 1),
        bytes_accessed=(feat.size * 2 + w1p.size * 2 + w2p.size * 2
                        + (b1p.size + b2p.size) * 4
                        + Bpad * OUT_PAD * 4),
    )

    out_padded = pl.pallas_call(
        head_kernel,
        out_shape=jax.ShapeDtypeStruct((Bpad, OUT_PAD), jnp.float32),
        grid=(Bpad // TB,),
        in_specs=[
            pl.BlockSpec((TB, FEAT_DIM), lambda i: (i, 0)),      # pooled features (tiled)
            pl.BlockSpec((FEAT_DIM, HIDDEN), lambda i: (0, 0)),  # w1 (bf16, grid-invariant)
            pl.BlockSpec((1, HIDDEN), lambda i: (0, 0)),         # b1 (f32)
            pl.BlockSpec((HIDDEN, OUT_PAD), lambda i: (0, 0)),   # w2 (bf16, padded)
            pl.BlockSpec((1, OUT_PAD), lambda i: (0, 0)),        # b2 (f32, padded -1e30)
        ],
        out_specs=pl.BlockSpec((TB, OUT_PAD), lambda i: (i, 0)),
        compiler_params=pltpu.CompilerParams(
            dimension_semantics=("parallel",),
            vmem_limit_bytes=16 << 20,
        ),
        cost_estimate=cost,
    )(feat, w1p, b1p, w2p, b2p)

    return out_padded[:B, :OUT_DIM]


def reference_forward(x_nchw, w1, b1, w2, b2):
    """Pure-JAX f32 reference for the same avgpool + fc head."""
    feat = jnp.mean(x_nchw.astype(jnp.float32), axis=(2, 3))          # [B, 2048]
    h = jnp.maximum(feat @ w1 + b1, 0.0)                              # [B, 256]
    logits = h @ w2 + b2                                              # [B, 10]
    return jax.nn.log_softmax(logits, axis=1)


if __name__ == "__main__":
    key = jax.random.PRNGKey(0)
    k_x, k_w1, k_b1, k_w2, k_b2, k_x2 = jax.random.split(key, 6)

    # Small, module-consistent shapes: batch=4, pre-pool feature map 2048x7x7
    # (what ResNet50 produces for a 224x224 image).
    B, H, W = 4, 7, 7
    x = jax.random.normal(k_x, (B, FEAT_DIM, H, W), jnp.float32)

    # Deterministic parameter init (PyTorch-Linear-style uniform bounds).
    lim1 = 1.0 / jnp.sqrt(FEAT_DIM)
    lim2 = 1.0 / jnp.sqrt(HIDDEN)
    w1 = jax.random.uniform(k_w1, (FEAT_DIM, HIDDEN), jnp.float32, -lim1, lim1)
    b1 = jax.random.uniform(k_b1, (HIDDEN,), jnp.float32, -lim1, lim1)
    w2 = jax.random.uniform(k_w2, (HIDDEN, OUT_DIM), jnp.float32, -lim2, lim2)
    b2 = jax.random.uniform(k_b2, (OUT_DIM,), jnp.float32, -lim2, lim2)

    # One-time weight prep (hoisted out of the per-call forward).
    params = prepare_head_params(w1, b1, w2, b2, pool_hw=H * W)
    params = jax.block_until_ready(params)

    # Single-tile (small batch) path.
    out = jax.block_until_ready(model_head_forward(x, *params))
    ref = reference_forward(x, w1, b1, w2, b2)
    assert out.shape == (B, OUT_DIM), out.shape
    # bf16 weight/feature cast -> loosened tolerance (log-prob rankings unaffected).
    assert jnp.allclose(out, ref, atol=2e-2, rtol=2e-2), (
        float(jnp.max(jnp.abs(out - ref))))

    # Multi-tile path: exercises batch padding + >=2 'parallel' grid steps (both v7x TCs).
    B2 = 40
    x2 = jax.random.normal(k_x2, (B2, FEAT_DIM, H, W), jnp.float32)
    out2 = jax.block_until_ready(model_head_forward(x2, *params))
    ref2 = reference_forward(x2, w1, b1, w2, b2)
    assert out2.shape == (B2, OUT_DIM), out2.shape
    assert jnp.allclose(out2, ref2, atol=2e-2, rtol=2e-2), (
        float(jnp.max(jnp.abs(out2 - ref2))))

    print("KERNEL_OK")
</pallas_src>

<mosaic_0001>
module attributes {stable_mosaic.version = 11 : i64} {
  func.func @head_kernel(%arg0: i32, %arg1: memref<16x2048xbf16, #tpu.memory_space<vmem>>, %arg2: memref<2048x256xbf16, #tpu.memory_space<vmem>>, %arg3: memref<1x256xf32, #tpu.memory_space<vmem>>, %arg4: memref<256x128xbf16, #tpu.memory_space<vmem>>, %arg5: memref<1x128xf32, #tpu.memory_space<vmem>>, %arg6: memref<16x128xf32, #tpu.memory_space<vmem>>) attributes {dimension_semantics = [#tpu.dimension_semantics<parallel>], iteration_bounds = array<i64: 1>, scalar_prefetch = 0 : i64, scratch_operands = 0 : i64, tpu.core_type = #tpu.core_type<tc>, window_params = [{transform_indices = @transform_0, window_bounds = array<i64: 16, 2048>}, {pipeline_mode = #tpu.pipeline_mode<synchronous>, transform_indices = @transform_1, window_bounds = array<i64: 2048, 256>}, {pipeline_mode = #tpu.pipeline_mode<synchronous>, transform_indices = @transform_2, window_bounds = array<i64: 1, 256>}, {pipeline_mode = #tpu.pipeline_mode<synchronous>, transform_indices = @transform_3, window_bounds = array<i64: 256, 128>}, {pipeline_mode = #tpu.pipeline_mode<synchronous>, transform_indices = @transform_4, window_bounds = array<i64: 1, 128>}, {transform_indices = @transform_5, window_bounds = array<i64: 16, 128>}]} {
    %c0 = arith.constant 0 : index
    %c0_0 = arith.constant 0 : index
    %0 = vector.load %arg1[%c0, %c0_0] : memref<16x2048xbf16, #tpu.memory_space<vmem>>, vector<16x2048xbf16>
    %c0_1 = arith.constant 0 : index
    %c0_2 = arith.constant 0 : index
    %1 = vector.load %arg2[%c0_1, %c0_2] : memref<2048x256xbf16, #tpu.memory_space<vmem>>, vector<2048x256xbf16>
    %cst = arith.constant dense<0.000000e+00> : vector<16x256xf32>
    %2 = tpu.matmul %0, %1, %cst {dimension_numbers = #tpu.dot_dimension_numbers<[1], [0], [0], [1], [0, 0, 1, 1], [], []>} : vector<16x2048xbf16>, vector<2048x256xbf16>, vector<16x256xf32> -> vector<16x256xf32>
    %c0_3 = arith.constant 0 : index
    %c0_4 = arith.constant 0 : index
    %3 = vector.load %arg3[%c0_3, %c0_4] : memref<1x256xf32, #tpu.memory_space<vmem>>, vector<1x256xf32>
    %4 = vector.broadcast %3 : vector<1x256xf32> to vector<16x256xf32>
    %5 = arith.addf %2, %4 : vector<16x256xf32>
    %cst_5 = arith.constant 0.000000e+00 : f32
    %6 = vector.broadcast %cst_5 : f32 to vector<16x256xf32>
    %7 = arith.maximumf %5, %6 : vector<16x256xf32>
    %8 = arith.truncf %7 : vector<16x256xf32> to vector<16x256xbf16>
    %c0_6 = arith.constant 0 : index
    %c0_7 = arith.constant 0 : index
    %9 = vector.load %arg4[%c0_6, %c0_7] : memref<256x128xbf16, #tpu.memory_space<vmem>>, vector<256x128xbf16>
    %cst_8 = arith.constant dense<0.000000e+00> : vector<16x128xf32>
    %10 = tpu.matmul %8, %9, %cst_8 {dimension_numbers = #tpu.dot_dimension_numbers<[1], [0], [0], [1], [0, 0, 1, 1], [], []>} : vector<16x256xbf16>, vector<256x128xbf16>, vector<16x128xf32> -> vector<16x128xf32>
    %c0_9 = arith.constant 0 : index
    %c0_10 = arith.constant 0 : index
    %11 = vector.load %arg5[%c0_9, %c0_10] : memref<1x128xf32, #tpu.memory_space<vmem>>, vector<1x128xf32>
    %12 = vector.broadcast %11 : vector<1x128xf32> to vector<16x128xf32>
    %13 = arith.addf %10, %12 : vector<16x128xf32>
    %cst_11 = arith.constant dense<0xFF800000> : vector<16xf32>
    %14 = vector.multi_reduction <maximumf>, %13, %cst_11 [1] : vector<16x128xf32> to vector<16xf32>
    %15 = vector.shape_cast %14 : vector<16xf32> to vector<16x1xf32>
    %16 = vector.broadcast %15 : vector<16x1xf32> to vector<16x128xf32>
    %17 = arith.subf %13, %16 : vector<16x128xf32>
    %18 = math.exp %17 : vector<16x128xf32>
    %cst_12 = arith.constant dense<0.000000e+00> : vector<16xf32>
    %19 = vector.multi_reduction <add>, %18, %cst_12 [1] : vector<16x128xf32> to vector<16xf32>
    %20 = vector.shape_cast %19 : vector<16xf32> to vector<16x1xf32>
    %21 = math.log %20 : vector<16x1xf32>
    %22 = vector.broadcast %21 : vector<16x1xf32> to vector<16x128xf32>
    %23 = arith.subf %17, %22 : vector<16x128xf32>
    %c0_13 = arith.constant 0 : index
    %c0_14 = arith.constant 0 : index
    %24 = vector.load %arg6[%c0_13, %c0_14] : memref<16x128xf32, #tpu.memory_space<vmem>>, vector<16x128xf32>
    tpu.vector_store %arg6[%c0_13, %c0_14], %23 {strides = array<i32>} : memref<16x128xf32, #tpu.memory_space<vmem>>, vector<16x128xf32>,
    return
  }
  func.func @transform_0(%arg0: i32) -> (i32, i32) {
    %c0_i32 = arith.constant 0 : i32
    %c0_i32_0 = arith.constant 0 : i32
    return %arg0, %c0_i32 : i32, i32
  }
  func.func @transform_1(%arg0: i32) -> (i32, i32) {
    %c0_i32 = arith.constant 0 : i32
    %c0_i32_0 = arith.constant 0 : i32
    %c0_i32_1 = arith.constant 0 : i32
    return %c0_i32, %c0_i32_0 : i32, i32
  }
  func.func @transform_2(%arg0: i32) -> (i32, i32) {
    %c0_i32 = arith.constant 0 : i32
    %c0_i32_0 = arith.constant 0 : i32
    %c0_i32_1 = arith.constant 0 : i32
    return %c0_i32, %c0_i32_0 : i32, i32
  }
  func.func @transform_3(%arg0: i32) -> (i32, i32) {
    %c0_i32 = arith.constant 0 : i32
    %c0_i32_0 = arith.constant 0 : i32
    %c0_i32_1 = arith.constant 0 : i32
    return %c0_i32, %c0_i32_0 : i32, i32
  }
  func.func @transform_4(%arg0: i32) -> (i32, i32) {
    %c0_i32 = arith.constant 0 : i32
    %c0_i32_0 = arith.constant 0 : i32
    %c0_i32_1 = arith.constant 0 : i32
    return %c0_i32, %c0_i32_0 : i32, i32
  }
  func.func @transform_5(%arg0: i32) -> (i32, i32) {
    %c0_i32 = arith.constant 0 : i32
    %c0_i32_0 = arith.constant 0 : i32
    return %arg0, %c0_i32 : i32, i32
  }
}

</mosaic_0001>

<bundles_post_ra>
// kernel: model_head_forward.1
= control target key start
LH: loop header
LB: loop body
LE: loop exit
PB: predicated region body
PF: predicated region fallthrough
CT: control target
= control target key end

     0   :  { %s3922_s1 = inlined_call_operand.vmem [shape: bf16[2048,256], index: 1, kind: input, shape index: {}]   ;;  %s3923_s0 = inlined_call_operand.vmem [shape: bf16[16,2048], index: 0, kind: input, shape index: {}]   ;;  %s3924_s3 = inlined_call_operand.vmem [shape: bf16[256,128], index: 3, kind: input, shape index: {}]   ;;  %s3925_s2 = inlined_call_operand.vmem [shape: f32[1,256], index: 2, kind: input, shape index: {}]   ;;  %s3926_s4 = inlined_call_operand.vmem [shape: f32[1,128], index: 4, kind: input, shape index: {}]   ;;  %s3927_s5 = inlined_call_operand.vmem [shape: f32[16,128], index: 5, kind: output, shape index: {}]  }
   0x1   :  { %v2560_v0 = vld [vmem:[%s3922_s1 + $0x4] ss:$8 sps:$4 sm:$0xff]   ;;  %v2564_v2 = vld [vmem:[%s3922_s1] ss:$8 sps:$4 sm:$0xff]   ;;  %v2566_v4 = vld [vmem:[%s3922_s1 + $0x14] ss:$8 sps:$4 sm:$0xff]  }
   0x2   :  { %v2562_v1 = vld [vmem:[%s3922_s1 + $0x404] ss:$8 sps:$4 sm:$0xff]   ;;  %1665 = vmatprep.subr.bf16.mxu1 %v2560_v0  ;;  %v2565_v3 = vld [vmem:[%s3922_s1 + $0x400] ss:$8 sps:$4 sm:$0xff]   ;;  %v2568_v5 = vld [vmem:[%s3922_s1 + $0x414] ss:$8 sps:$4 sm:$0xff]  }
   0x3   :  { %1837 = vmatprep.subr.bf16.mxu0 %v2562_v1  ;;  %1666 = vmatpush1.bf16.msra.mxu1 %v2564_v2  ;;  %v2570_v6 = vld [vmem:[%s3922_s1 + $0x10] ss:$8 sps:$4 sm:$0xff]   ;;  %v2572_v8 = vld [vmem:[%s3922_s1 + $0x24] ss:$8 sps:$4 sm:$0xff]   ;;  %v2576_v10 = vld [vmem:[%s3922_s1 + $0x20] ss:$8 sps:$4 sm:$0xff]  }
   0x4   :  { %1838 = vmatpush1.bf16.msra.mxu0 %v2565_v3  ;;  %1667 = vmatprep.subr.bf16.mxu1 %v2566_v4  ;;  %v2571_v7 = vld [vmem:[%s3922_s1 + $0x410] ss:$8 sps:$4 sm:$0xff]   ;;  %v2574_v9 = vld [vmem:[%s3922_s1 + $0x424] ss:$8 sps:$4 sm:$0xff]   ;;  %v2577_v11 = vld [vmem:[%s3922_s1 + $0x420] ss:$8 sps:$4 sm:$0xff]  }
   0x5   :  { %1839 = vmatprep.subr.bf16.mxu0 %v2568_v5  ;;  %v2578_v12 = vld [vmem:[%s3922_s1 + $0x34] ss:$8 sps:$4 sm:$0xff]   ;;  %v2582_v14 = vld [vmem:[%s3922_s1 + $0x30] ss:$8 sps:$4 sm:$0xff]   ;;  %v2584_v16 = vld [vmem:[%s3922_s1 + $0x44] ss:$8 sps:$4 sm:$0xff]  }
   0x6   :  { %v2580_v13 = vld [vmem:[%s3922_s1 + $0x434] ss:$8 sps:$4 sm:$0xff]   ;;  %v2583_v15 = vld [vmem:[%s3922_s1 + $0x430] ss:$8 sps:$4 sm:$0xff]   ;;  %v2586_v17 = vld [vmem:[%s3922_s1 + $0x444] ss:$8 sps:$4 sm:$0xff]  }
   0x7   :  { %1668 = vmatpush1.bf16.msra.mxu1 %v2570_v6  ;;  %v2588_v18 = vld [vmem:[%s3922_s1 + $0x40] ss:$8 sps:$4 sm:$0xff]   ;;  %v2590_v20 = vld [vmem:[%s3922_s1 + $0x54] ss:$8 sps:$4 sm:$0xff]   ;;  %v2594_v22 = vld [vmem:[%s3922_s1 + $0x50] ss:$8 sps:$4 sm:$0xff]  }
   0x8   :  { %1840 = vmatpush1.bf16.msra.mxu0 %v2571_v7  ;;  %1669 = vmatprep.subr.bf16.mxu1 %v2572_v8  ;;  %v2589_v19 = vld [vmem:[%s3922_s1 + $0x440] ss:$8 sps:$4 sm:$0xff]   ;;  %v2592_v21 = vld [vmem:[%s3922_s1 + $0x454] ss:$8 sps:$4 sm:$0xff]   ;;  %v2595_v23 = vld [vmem:[%s3922_s1 + $0x450] ss:$8 sps:$4 sm:$0xff]  }
   0x9   :  { %1841 = vmatprep.subr.bf16.mxu0 %v2574_v9  ;;  %v2596_v24 = vld [vmem:[%s3922_s1 + $0x64] ss:$8 sps:$4 sm:$0xff]   ;;  %v2600_v26 = vld [vmem:[%s3922_s1 + $0x60] ss:$8 sps:$4 sm:$0xff]   ;;  %v2602_v28 = vld [vmem:[%s3922_s1 + $0x74] ss:$8 sps:$4 sm:$0xff]  }
   0xa   :  { %v2598_v25 = vld [vmem:[%s3922_s1 + $0x464] ss:$8 sps:$4 sm:$0xff]   ;;  %v2601_v27 = vld [vmem:[%s3922_s1 + $0x460] ss:$8 sps:$4 sm:$0xff]   ;;  %v2604_v29 = vld [vmem:[%s3922_s1 + $0x474] ss:$8 sps:$4 sm:$0xff]  }
   0xb   :  { %1670 = vmatpush1.bf16.msra.mxu1 %v2576_v10  ;;  %v2606_v30 = vld [vmem:[%s3922_s1 + $0x70] ss:$8 sps:$4 sm:$0xff]   ;;  %v2608_v32 = vld [vmem:[%s3922_s1 + $0x84] ss:$8 sps:$4 sm:$0xff]   ;;  %v2612_v34 = vld [vmem:[%s3922_s1 + $0x80] ss:$8 sps:$4 sm:$0xff]  }
   0xc   :  { %1842 = vmatpush1.bf16.msra.mxu0 %v2577_v11  ;;  %1671 = vmatprep.subr.bf16.mxu1 %v2578_v12  ;;  %v2607_v31 = vld [vmem:[%s3922_s1 + $0x470] ss:$8 sps:$4 sm:$0xff]   ;;  %v2610_v33 = vld [vmem:[%s3922_s1 + $0x484] ss:$8 sps:$4 sm:$0xff]   ;;  %v2613_v35 = vld [vmem:[%s3922_s1 + $0x480] ss:$8 sps:$4 sm:$0xff]  }
   0xd   :  { %1843 = vmatprep.subr.bf16.mxu0 %v2580_v13  ;;  %v2614_v36 = vld [vmem:[%s3922_s1 + $0x94] ss:$8 sps:$4 sm:$0xff]   ;;  %v2618_v38 = vld [vmem:[%s3922_s1 + $0x90] ss:$8 sps:$4 sm:$0xff]   ;;  %v2620_v40 = vld [vmem:[%s3922_s1 + $0xa4] ss:$8 sps:$4 sm:$0xff]  }
   0xe   :  { %v2616_v37 = vld [vmem:[%s3922_s1 + $0x494] ss:$8 sps:$4 sm:$0xff]   ;;  %v2619_v39 = vld [vmem:[%s3922_s1 + $0x490] ss:$8 sps:$4 sm:$0xff]   ;;  %v2622_v41 = vld [vmem:[%s3922_s1 + $0x4a4] ss:$8 sps:$4 sm:$0xff]  }
   0xf   :  { %1672 = vmatpush1.bf16.msra.mxu1 %v2582_v14  ;;  %v2624_v42 = vld [vmem:[%s3922_s1 + $0xa0] ss:$8 sps:$4 sm:$0xff]   ;;  %v2626_v44 = vld [vmem:[%s3922_s1 + $0xb4] ss:$8 sps:$4 sm:$0xff]   ;;  %v2630_v46 = vld [vmem:[%s3922_s1 + $0xb0] ss:$8 sps:$4 sm:$0xff]  }
  0x10   :  { %1844 = vmatpush1.bf16.msra.mxu0 %v2583_v15  ;;  %1673 = vmatprep.subr.bf16.mxu1 %v2584_v16  ;;  %v2625_v43 = vld [vmem:[%s3922_s1 + $0x4a0] ss:$8 sps:$4 sm:$0xff]   ;;  %v2628_v45 = vld [vmem:[%s3922_s1 + $0x4b4] ss:$8 sps:$4 sm:$0xff]   ;;  %v2631_v47 = vld [vmem:[%s3922_s1 + $0x4b0] ss:$8 sps:$4 sm:$0xff]  }
  0x11   :  { %1845 = vmatprep.subr.bf16.mxu0 %v2586_v17  ;;  %v21_v48 = vld [vmem:[%s3923_s0] sm:$0xff]  ;;  %v2638_v58 = vld [vmem:[%s3922_s1 + $0xd4] ss:$8 sps:$4 sm:$0xff]   ;;  %v2642_v60 = vld [vmem:[%s3922_s1 + $0xd0] ss:$8 sps:$4 sm:$0xff]  }
  0x12   :  { %v29_v49 = vld [vmem:[%s3923_s0 + $0x40] sm:$0xff]  ;;  %v2640_v59 = vld [vmem:[%s3922_s1 + $0x4d4] ss:$8 sps:$4 sm:$0xff]   ;;  %v2643_v61 = vld [vmem:[%s3922_s1 + $0x4d0] ss:$8 sps:$4 sm:$0xff]  }
  0x13   :  { %1674 = vmatpush1.bf16.msra.mxu1 %v2588_v18  ;;  %v2632_v50 = vld [vmem:[%s3922_s1 + $0xc4] ss:$8 sps:$4 sm:$0xff]   ;;  %v2218_v52 = vcombine.high %v21_v48, %v29_v49  ;;  %v2636_v56 = vld [vmem:[%s3922_s1 + $0xc0] ss:$8 sps:$4 sm:$0xff]   ;;  %v2650_v2 = vld [vmem:[%s3922_s1 + $0xf4] ss:$8 sps:$4 sm:$0xff]   ;;  %v2217_v8 = vcombine.low %v21_v48, %v29_v49 }
  0x14   :  { %1846 = vmatpush1.bf16.msra.mxu0 %v2589_v19  ;;  %1675 = vmatprep.subr.bf16.mxu1 %v2590_v20  ;;  %v2634_v51 = vld [vmem:[%s3922_s1 + $0x4c4] ss:$8 sps:$4 sm:$0xff]   ;;  %v2637_v57 = vld [vmem:[%s3922_s1 + $0x4c0] ss:$8 sps:$4 sm:$0xff]   ;;  %v2652_v3 = vld [vmem:[%s3922_s1 + $0x4f4] ss:$8 sps:$4 sm:$0xff]  }
  0x15   :  { %1847 = vmatprep.subr.bf16.mxu0 %v2592_v21  ;;  %v25_v53 = vld [vmem:[%s3923_s0 + $0x20] sm:$0xff]  ;;  %1697 = vmatprep.mubr.bf16.mxu1 %v2218_v52  ;;  %v2654_v4 = vld [vmem:[%s3922_s1 + $0xf0] ss:$8 sps:$4 sm:$0xff]   ;;  %v2664_v12 = vld [vmem:[%s3922_s1 + $0x114] ss:$8 sps:$4 sm:$0xff]  }
  0x16   :  { %v33_v54 = vld [vmem:[%s3923_s0 + $0x60] sm:$0xff]  ;;  %v2655_v5 = vld [vmem:[%s3922_s1 + $0x4f0] ss:$8 sps:$4 sm:$0xff]   ;;  %v2667_v13 = vld [vmem:[%s3922_s1 + $0x514] ss:$8 sps:$4 sm:$0xff]  }
  0x17   :  { %1676 = vmatpush1.bf16.msra.mxu1 %v2594_v22  ;;  %v2226_v55 = vcombine.high %v25_v53, %v33_v54  ;;  %v2644_v62 = vld [vmem:[%s3922_s1 + $0xe4] ss:$8 sps:$4 sm:$0xff]   ;;  %v2648_v0 = vld [vmem:[%s3922_s1 + $0xe0] ss:$8 sps:$4 sm:$0xff]   ;;  %v2225_v10 = vcombine.low %v25_v53, %v33_v54  ;;  %v2662_v14 = vld [vmem:[%s3922_s1 + $0x110] ss:$8 sps:$4 sm:$0xff]  }
  0x18   :  { %1848 = vmatpush1.bf16.msra.mxu0 %v2595_v23  ;;  %1677 = vmatprep.subr.bf16.mxu1 %v2596_v24  ;;  %v2646_v63 = vld [vmem:[%s3922_s1 + $0x4e4] ss:$8 sps:$4 sm:$0xff]   ;;  %v2649_v1 = vld [vmem:[%s3922_s1 + $0x4e0] ss:$8 sps:$4 sm:$0xff]   ;;  %v2665_v15 = vld [vmem:[%s3922_s1 + $0x510] ss:$8 sps:$4 sm:$0xff]  }
  0x19   :  { %1849 = vmatprep.subr.bf16.mxu0 %v2598_v25  ;;  %1869 = vmatprep.mubr.bf16.mxu0 %v2226_v55  ;;  %v2658_v6 = vld [vmem:[%s3922_s1 + $0x104] ss:$8 sps:$4 sm:$0xff]   ;;  %v2656_v9 = vld [vmem:[%s3922_s1 + $0x100] ss:$8 sps:$4 sm:$0xff]   ;;  %v2676_v20 = vld [vmem:[%s3922_s1 + $0x134] ss:$8 sps:$4 sm:$0xff]  }
  0x1a   :  { %v2661_v7 = vld [vmem:[%s3922_s1 + $0x504] ss:$8 sps:$4 sm:$0xff]   ;;  %v2659_v11 = vld [vmem:[%s3922_s1 + $0x500] ss:$8 sps:$4 sm:$0xff]   ;;  %v2679_v21 = vld [vmem:[%s3922_s1 + $0x534] ss:$8 sps:$4 sm:$0xff]  }
  0x1b   :  { %1678 = vmatpush1.bf16.msra.mxu1 %v2600_v26  ;;  %v2670_v16 = vld [vmem:[%s3922_s1 + $0x124] ss:$8 sps:$4 sm:$0xff]   ;;  %v2668_v18 = vld [vmem:[%s3922_s1 + $0x120] ss:$8 sps:$4 sm:$0xff]   ;;  %v2674_v22 = vld [vmem:[%s3922_s1 + $0x130] ss:$8 sps:$4 sm:$0xff]  }
  0x1c   :  { %1850 = vmatpush1.bf16.msra.mxu0 %v2601_v27  ;;  %1679 = vmatprep.subr.bf16.mxu1 %v2602_v28  ;;  %v2673_v17 = vld [vmem:[%s3922_s1 + $0x524] ss:$8 sps:$4 sm:$0xff]   ;;  %v2671_v19 = vld [vmem:[%s3922_s1 + $0x520] ss:$8 sps:$4 sm:$0xff]   ;;  %v2677_v23 = vld [vmem:[%s3922_s1 + $0x530] ss:$8 sps:$4 sm:$0xff]  }
  0x1d   :  { %1851 = vmatprep.subr.bf16.mxu0 %v2604_v29  ;;  %v2682_v24 = vld [vmem:[%s3922_s1 + $0x144] ss:$8 sps:$4 sm:$0xff]   ;;  %v2680_v26 = vld [vmem:[%s3922_s1 + $0x140] ss:$8 sps:$4 sm:$0xff]   ;;  %v2688_v28 = vld [vmem:[%s3922_s1 + $0x154] ss:$8 sps:$4 sm:$0xff]  }
  0x1e   :  { %v2685_v25 = vld [vmem:[%s3922_s1 + $0x544] ss:$8 sps:$4 sm:$0xff]   ;;  %v2683_v27 = vld [vmem:[%s3922_s1 + $0x540] ss:$8 sps:$4 sm:$0xff]   ;;  %v2691_v29 = vld [vmem:[%s3922_s1 + $0x554] ss:$8 sps:$4 sm:$0xff]  }
  0x1f   :  { %1680 = vmatpush1.bf16.msra.mxu1 %v2606_v30  ;;  %v2686_v30 = vld [vmem:[%s3922_s1 + $0x150] ss:$8 sps:$4 sm:$0xff]   ;;  %v2704_v48 = vld [vmem:[%s3922_s1 + $0x180] ss:$8 sps:$4 sm:$0xff]   ;;  %v2718_v54 = vld [vmem:[%s3922_s1 + $0x1a4] ss:$8 sps:$4 sm:$0xff]  }
  0x20   :  { %1852 = vmatpush1.bf16.msra.mxu0 %v2607_v31  ;;  %1681 = vmatprep.subr.bf16.mxu1 %v2608_v32  ;;  %v2689_v31 = vld [vmem:[%s3922_s1 + $0x550] ss:$8 sps:$4 sm:$0xff]   ;;  %v2694_v32 = vld [vmem:[%s3922_s1 + $0x164] ss:$8 sps:$4 sm:$0xff]   ;;  %v2707_v49 = vld [vmem:[%s3922_s1 + $0x580] ss:$8 sps:$4 sm:$0xff]  }
  0x21   :  { %1853 = vmatprep.subr.bf16.mxu0 %v2610_v33  ;;  %v2697_v33 = vld [vmem:[%s3922_s1 + $0x564] ss:$8 sps:$4 sm:$0xff]   ;;  %v2710_v52 = vld [vmem:[%s3922_s1 + $0x190] ss:$8 sps:$4 sm:$0xff]  }
  0x22   :  { %v2713_v53 = vld [vmem:[%s3922_s1 + $0x590] ss:$8 sps:$4 sm:$0xff]   ;;  %v2721_v55 = vld [vmem:[%s3922_s1 + $0x5a4] ss:$8 sps:$4 sm:$0xff]  }
  0x23   :  { %1682 = vmatpush1.bf16.msra.mxu1 %v2612_v34  ;;  %v2692_v34 = vld [vmem:[%s3922_s1 + $0x160] ss:$8 sps:$4 sm:$0xff]  }
  0x24   :  { %1854 = vmatpush1.bf16.msra.mxu0 %v2613_v35  ;;  %1683 = vmatprep.subr.bf16.mxu1 %v2614_v36  ;;  %v2695_v35 = vld [vmem:[%s3922_s1 + $0x560] ss:$8 sps:$4 sm:$0xff]  }
  0x25   :  { %1855 = vmatprep.subr.bf16.mxu0 %v2616_v37  ;;  %v3289_v36 = vld [vmem:[%s3923_s0 + $0x8] sm:$0xff] }
  0x26   :  { %v3294_v37 = vld [vmem:[%s3923_s0 + $0x48] sm:$0xff] }
  0x27   :  { %1684 = vmatpush1.bf16.msra.mxu1 %v2618_v38  ;;  %v2700_v38 = vld [vmem:[%s3922_s1 + $0x174] ss:$8 sps:$4 sm:$0xff]  }
  0x28   :  { %1856 = vmatpush1.bf16.msra.mxu0 %v2619_v39  ;;  %1685 = vmatprep.subr.bf16.mxu1 %v2620_v40  ;;  %v2703_v39 = vld [vmem:[%s3922_s1 + $0x574] ss:$8 sps:$4 sm:$0xff]   ;;  %v2220_v40 = vcombine.high %v3289_v36, %v3294_v37 }
  0x29   :  { %1857 = vmatprep.subr.bf16.mxu0 %v2622_v41  ;;  %v3307_v41 = vld [vmem:[%s3923_s0 + $0x28] sm:$0xff] }
  0x2b   :  { %1686 = vmatpush1.bf16.msra.mxu1 %v2624_v42  ;;  %v3312_v42 = vld [vmem:[%s3923_s0 + $0x68] sm:$0xff] }
  0x2c   :  { %1858 = vmatpush1.bf16.msra.mxu0 %v2625_v43  ;;  %1687 = vmatprep.subr.bf16.mxu1 %v2626_v44  ;;  %v2228_v43 = vcombine.high %v3307_v41, %v3312_v42  ;;  %v2698_v44 = vld [vmem:[%s3922_s1 + $0x170] ss:$8 sps:$4 sm:$0xff]  }
  0x2d   :  { %1859 = vmatprep.subr.bf16.mxu0 %v2628_v45  ;;  %v2701_v45 = vld [vmem:[%s3922_s1 + $0x570] ss:$8 sps:$4 sm:$0xff]  }
  0x2f   :  { %1688 = vmatpush1.bf16.msra.mxu1 %v2630_v46  ;;  %v2706_v46 = vld [vmem:[%s3922_s1 + $0x184] ss:$8 sps:$4 sm:$0xff]  }
  0x30   :  { %1860 = vmatpush1.bf16.msra.mxu0 %v2631_v47  ;;  %1689 = vmatprep.subr.bf16.mxu1 %v2632_v50  ;;  %v2709_v47 = vld [vmem:[%s3922_s1 + $0x584] ss:$8 sps:$4 sm:$0xff]   ;;  %v2712_v50 = vld [vmem:[%s3922_s1 + $0x194] ss:$8 sps:$4 sm:$0xff]  }
  0x31   :  { %1861 = vmatprep.subr.bf16.mxu0 %v2634_v51  ;;  %v2715_v51 = vld [vmem:[%s3922_s1 + $0x594] ss:$8 sps:$4 sm:$0xff]  }
  0x33   :  { %1690 = vmatpush1.bf16.msra.mxu1 %v2636_v56  ;;  %v2716_v56 = vld [vmem:[%s3922_s1 + $0x1a0] ss:$8 sps:$4 sm:$0xff]  }
  0x34   :  { %1862 = vmatpush1.bf16.msra.mxu0 %v2637_v57  ;;  %1691 = vmatprep.subr.bf16.mxu1 %v2638_v58  ;;  %v2719_v57 = vld [vmem:[%s3922_s1 + $0x5a0] ss:$8 sps:$4 sm:$0xff]   ;;  %v2724_v58 = vld [vmem:[%s3922_s1 + $0x1b4] ss:$8 sps:$4 sm:$0xff]  }
  0x35   :  { %1863 = vmatprep.subr.bf16.mxu0 %v2640_v59  ;;  %v2727_v59 = vld [vmem:[%s3922_s1 + $0x5b4] ss:$8 sps:$4 sm:$0xff]  }
  0x37   :  { %1692 = vmatpush1.bf16.msra.mxu1 %v2642_v60  ;;  %v2722_v60 = vld [vmem:[%s3922_s1 + $0x1b0] ss:$8 sps:$4 sm:$0xff]  }
  0x38   :  { %1864 = vmatpush1.bf16.msra.mxu0 %v2643_v61  ;;  %1693 = vmatprep.subr.bf16.mxu1 %v2644_v62  ;;  %v2725_v61 = vld [vmem:[%s3922_s1 + $0x5b0] ss:$8 sps:$4 sm:$0xff]   ;;  %v2730_v62 = vld [vmem:[%s3922_s1 + $0x1c4] ss:$8 sps:$4 sm:$0xff]  }
  0x39   :  { %1865 = vmatprep.subr.bf16.mxu0 %v2646_v63  ;;  %v2733_v63 = vld [vmem:[%s3922_s1 + $0x5c4] ss:$8 sps:$4 sm:$0xff]  }
  0x3b   :  { %1694 = vmatpush1.bf16.msra.mxu1 %v2648_v0  ;;  %v2728_v0 = vld [vmem:[%s3922_s1 + $0x1c0] ss:$8 sps:$4 sm:$0xff]  }
  0x3c   :  { %1866 = vmatpush1.bf16.msra.mxu0 %v2649_v1  ;;  %1695 = vmatprep.subr.bf16.mxu1 %v2650_v2  ;;  %v2731_v1 = vld [vmem:[%s3922_s1 + $0x5c0] ss:$8 sps:$4 sm:$0xff]   ;;  %v2736_v2 = vld [vmem:[%s3922_s1 + $0x1d4] ss:$8 sps:$4 sm:$0xff]  }
  0x3d   :  { %1867 = vmatprep.subr.bf16.mxu0 %v2652_v3  ;;  %v2739_v3 = vld [vmem:[%s3922_s1 + $0x5d4] ss:$8 sps:$4 sm:$0xff]  }
  0x3f   :  { %1696 = vmatpush1.bf16.msra.mxu1 %v2654_v4  ;;  %v2734_v4 = vld [vmem:[%s3922_s1 + $0x1d0] ss:$8 sps:$4 sm:$0xff]  }
  0x40   :  { %1868 = vmatpush1.bf16.msra.mxu0 %v2655_v5  ;;  %1708 = vmatprep.subr.bf16.mxu1 %v2658_v6  ;;  %v2737_v5 = vld [vmem:[%s3922_s1 + $0x5d0] ss:$8 sps:$4 sm:$0xff]   ;;  %v2742_v6 = vld [vmem:[%s3922_s1 + $0x1e4] ss:$8 sps:$4 sm:$0xff]  }
  0x41   :  { %1880 = vmatprep.subr.bf16.mxu0 %v2661_v7  ;;  %v2745_v7 = vld [vmem:[%s3922_s1 + $0x5e4] ss:$8 sps:$4 sm:$0xff]  }
  0x42   :  { %1698 = vmatmul.mubr.bf16.vlgmr.msra.gmra.mrb[0].mxu1 %v2217_v8  ;;  %v2740_v8 = vld [vmem:[%s3922_s1 + $0x1e0] ss:$8 sps:$4 sm:$0xff]  }
  0x43   :  { %1870 = vmatmul.mubr.bf16.vlgmr.msra.gmra.mrb[0].mxu0 %v2225_v10  ;;  %1709 = vmatpush1.bf16.msra.mxu1 %v2656_v9  ;;  %v2743_v9 = vld [vmem:[%s3922_s1 + $0x5e0] ss:$8 sps:$4 sm:$0xff]   ;;  %v2748_v10 = vld [vmem:[%s3922_s1 + $0x1f4] ss:$8 sps:$4 sm:$0xff]  }
  0x44   :  { %1881 = vmatpush1.bf16.msra.mxu0 %v2659_v11  ;;  %1710 = vmatprep.subr.bf16.mxu1 %v2664_v12  ;;  %v2751_v11 = vld [vmem:[%s3922_s1 + $0x5f4] ss:$8 sps:$4 sm:$0xff]   ;;  %v2746_v12 = vld [vmem:[%s3922_s1 + $0x1f0] ss:$8 sps:$4 sm:$0xff]  }
  0x45   :  { %1882 = vmatprep.subr.bf16.mxu0 %v2667_v13  ;;  %1740 = vmatprep.mubr.bf16.mxu1 %v2220_v40  ;;  %v2749_v13 = vld [vmem:[%s3922_s1 + $0x5f0] ss:$8 sps:$4 sm:$0xff]   ;;  %v2776_v40 = vld [vmem:[%s3922_s1 + $0x240] ss:$8 sps:$4 sm:$0xff]  }
  0x46   :  { %1912 = vmatprep.mubr.bf16.mxu0 %v2228_v43  ;;  %v2787_v43 = vld [vmem:[%s3922_s1 + $0x654] ss:$8 sps:$4 sm:$0xff]  }
  0x47   :  { %1711 = vmatpush1.bf16.msra.mxu1 %v2662_v14  ;;  %v2754_v14 = vld [vmem:[%s3922_s1 + $0x204] ss:$8 sps:$4 sm:$0xff]  }
  0x48   :  { %1883 = vmatpush1.bf16.msra.mxu0 %v2665_v15  ;;  %1712 = vmatprep.subr.bf16.mxu1 %v2670_v16  ;;  %v2757_v15 = vld [vmem:[%s3922_s1 + $0x604] ss:$8 sps:$4 sm:$0xff]   ;;  %v2219_v16 = vcombine.low %v3289_v36, %v3294_v37  ;;  %v2770_v36 = vld [vmem:[%s3922_s1 + $0x230] ss:$8 sps:$4 sm:$0xff]  }
  0x49   :  { %1884 = vmatprep.subr.bf16.mxu0 %v2673_v17  ;;  %v2752_v17 = vld [vmem:[%s3922_s1 + $0x200] ss:$8 sps:$4 sm:$0xff]   ;;  %v2773_v37 = vld [vmem:[%s3922_s1 + $0x630] ss:$8 sps:$4 sm:$0xff]  }
  0x4b   :  { %1713 = vmatpush1.bf16.msra.mxu1 %v2668_v18  ;;  %v2227_v18 = vcombine.low %v3307_v41, %v3312_v42  ;;  %v2779_v41 = vld [vmem:[%s3922_s1 + $0x640] ss:$8 sps:$4 sm:$0xff]   ;;  %v2784_v42 = vld [vmem:[%s3922_s1 + $0x254] ss:$8 sps:$4 sm:$0xff]  }
  0x4c   :  { %1885 = vmatpush1.bf16.msra.mxu0 %v2671_v19  ;;  %1714 = vmatprep.subr.bf16.mxu1 %v2676_v20  ;;  %v2755_v19 = vld [vmem:[%s3922_s1 + $0x600] ss:$8 sps:$4 sm:$0xff]   ;;  %v2760_v20 = vld [vmem:[%s3922_s1 + $0x214] ss:$8 sps:$4 sm:$0xff]  }
  0x4d   :  { %1886 = vmatprep.subr.bf16.mxu0 %v2679_v21  ;;  %v2763_v21 = vld [vmem:[%s3922_s1 + $0x614] ss:$8 sps:$4 sm:$0xff]  }
  0x4f   :  { %1715 = vmatpush1.bf16.msra.mxu1 %v2674_v22  ;;  %v2758_v22 = vld [vmem:[%s3922_s1 + $0x210] ss:$8 sps:$4 sm:$0xff]  }
  0x50   :  { %1887 = vmatpush1.bf16.msra.mxu0 %v2677_v23  ;;  %1716 = vmatprep.subr.bf16.mxu1 %v2682_v24  ;;  %v2761_v23 = vld [vmem:[%s3922_s1 + $0x610] ss:$8 sps:$4 sm:$0xff]  }
  0x51   :  { %1888 = vmatprep.subr.bf16.mxu0 %v2685_v25  ;;  %v3449_v24 = vld [vmem:[%s3923_s0 + $0x10] sm:$0xff] }
  0x52   :  { %v3454_v25 = vld [vmem:[%s3923_s0 + $0x50] sm:$0xff] }
  0x53   :  { %1717 = vmatpush1.bf16.msra.mxu1 %v2680_v26  ;;  %v2766_v26 = vld [vmem:[%s3922_s1 + $0x224] ss:$8 sps:$4 sm:$0xff]  }
  0x54   :  { %1889 = vmatpush1.bf16.msra.mxu0 %v2683_v27  ;;  %1718 = vmatprep.subr.bf16.mxu1 %v2688_v28  ;;  %v2769_v27 = vld [vmem:[%s3922_s1 + $0x624] ss:$8 sps:$4 sm:$0xff]   ;;  %v2222_v28 = vcombine.high %v3449_v24, %v3454_v25 }
  0x55   :  { %1890 = vmatprep.subr.bf16.mxu0 %v2691_v29  ;;  %v3467_v29 = vld [vmem:[%s3923_s0 + $0x30] sm:$0xff] }
  0x57   :  { %1719 = vmatpush1.bf16.msra.mxu1 %v2686_v30  ;;  %v3472_v30 = vld [vmem:[%s3923_s0 + $0x70] sm:$0xff] }
  0x58   :  { %1891 = vmatpush1.bf16.msra.mxu0 %v2689_v31  ;;  %1720 = vmatprep.subr.bf16.mxu1 %v2694_v32  ;;  %v2230_v31 = vcombine.high %v3467_v29, %v3472_v30  ;;  %v2764_v32 = vld [vmem:[%s3922_s1 + $0x220] ss:$8 sps:$4 sm:$0xff]  }
  0x59   :  { %1892 = vmatprep.subr.bf16.mxu0 %v2697_v33  ;;  %v2767_v33 = vld [vmem:[%s3922_s1 + $0x620] ss:$8 sps:$4 sm:$0xff]  }
  0x5b   :  { %1721 = vmatpush1.bf16.msra.mxu1 %v2692_v34  ;;  %v2772_v34 = vld [vmem:[%s3922_s1 + $0x234] ss:$8 sps:$4 sm:$0xff]  }
  0x5c   :  { %1893 = vmatpush1.bf16.msra.mxu0 %v2695_v35  ;;  %1722 = vmatprep.subr.bf16.mxu1 %v2700_v38  ;;  %v2775_v35 = vld [vmem:[%s3922_s1 + $0x634] ss:$8 sps:$4 sm:$0xff]   ;;  %v2778_v38 = vld [vmem:[%s3922_s1 + $0x244] ss:$8 sps:$4 sm:$0xff]  }
  0x5d   :  { %1894 = vmatprep.subr.bf16.mxu0 %v2703_v39  ;;  %v2781_v39 = vld [vmem:[%s3922_s1 + $0x644] ss:$8 sps:$4 sm:$0xff]  }
  0x5f   :  { %1723 = vmatpush1.bf16.msra.mxu1 %v2698_v44  ;;  %v2782_v44 = vld [vmem:[%s3922_s1 + $0x250] ss:$8 sps:$4 sm:$0xff]  }
  0x60   :  { %1895 = vmatpush1.bf16.msra.mxu0 %v2701_v45  ;;  %1724 = vmatprep.subr.bf16.mxu1 %v2706_v46  ;;  %v2785_v45 = vld [vmem:[%s3922_s1 + $0x650] ss:$8 sps:$4 sm:$0xff]   ;;  %v2790_v46 = vld [vmem:[%s3922_s1 + $0x264] ss:$8 sps:$4 sm:$0xff]  }
  0x61   :  { %1896 = vmatprep.subr.bf16.mxu0 %v2709_v47  ;;  %v2793_v47 = vld [vmem:[%s3922_s1 + $0x664] ss:$8 sps:$4 sm:$0xff]  }
  0x63   :  { %1725 = vmatpush1.bf16.msra.mxu1 %v2704_v48  ;;  %v2788_v48 = vld [vmem:[%s3922_s1 + $0x260] ss:$8 sps:$4 sm:$0xff]  }
  0x64   :  { %1897 = vmatpush1.bf16.msra.mxu0 %v2707_v49  ;;  %1726 = vmatprep.subr.bf16.mxu1 %v2712_v50  ;;  %v2791_v49 = vld [vmem:[%s3922_s1 + $0x660] ss:$8 sps:$4 sm:$0xff]   ;;  %v2796_v50 = vld [vmem:[%s3922_s1 + $0x274] ss:$8 sps:$4 sm:$0xff]  }
  0x65   :  { %1898 = vmatprep.subr.bf16.mxu0 %v2715_v51  ;;  %v2799_v51 = vld [vmem:[%s3922_s1 + $0x674] ss:$8 sps:$4 sm:$0xff]  }
  0x67   :  { %1727 = vmatpush1.bf16.msra.mxu1 %v2710_v52  ;;  %v2794_v52 = vld [vmem:[%s3922_s1 + $0x270] ss:$8 sps:$4 sm:$0xff]  }
  0x68   :  { %1899 = vmatpush1.bf16.msra.mxu0 %v2713_v53  ;;  %1728 = vmatprep.subr.bf16.mxu1 %v2718_v54  ;;  %v2797_v53 = vld [vmem:[%s3922_s1 + $0x670] ss:$8 sps:$4 sm:$0xff]   ;;  %v2802_v54 = vld [vmem:[%s3922_s1 + $0x284] ss:$8 sps:$4 sm:$0xff]  }
  0x69   :  { %1900 = vmatprep.subr.bf16.mxu0 %v2721_v55  ;;  %v2805_v55 = vld [vmem:[%s3922_s1 + $0x684] ss:$8 sps:$4 sm:$0xff]  }
  0x6b   :  { %1729 = vmatpush1.bf16.msra.mxu1 %v2716_v56  ;;  %v2800_v56 = vld [vmem:[%s3922_s1 + $0x280] ss:$8 sps:$4 sm:$0xff]  }
  0x6c   :  { %1901 = vmatpush1.bf16.msra.mxu0 %v2719_v57  ;;  %1730 = vmatprep.subr.bf16.mxu1 %v2724_v58  ;;  %v2803_v57 = vld [vmem:[%s3922_s1 + $0x680] ss:$8 sps:$4 sm:$0xff]   ;;  %v2808_v58 = vld [vmem:[%s3922_s1 + $0x294] ss:$8 sps:$4 sm:$0xff]  }
  0x6d   :  { %1902 = vmatprep.subr.bf16.mxu0 %v2727_v59  ;;  %v2811_v59 = vld [vmem:[%s3922_s1 + $0x694] ss:$8 sps:$4 sm:$0xff]  }
  0x6f   :  { %1731 = vmatpush1.bf16.msra.mxu1 %v2722_v60  ;;  %v2806_v60 = vld [vmem:[%s3922_s1 + $0x290] ss:$8 sps:$4 sm:$0xff]  }
  0x70   :  { %1903 = vmatpush1.bf16.msra.mxu0 %v2725_v61  ;;  %1732 = vmatprep.subr.bf16.mxu1 %v2730_v62  ;;  %v2809_v61 = vld [vmem:[%s3922_s1 + $0x690] ss:$8 sps:$4 sm:$0xff]   ;;  %v2814_v62 = vld [vmem:[%s3922_s1 + $0x2a4] ss:$8 sps:$4 sm:$0xff]  }
  0x71   :  { %1904 = vmatprep.subr.bf16.mxu0 %v2733_v63  ;;  %v2817_v63 = vld [vmem:[%s3922_s1 + $0x6a4] ss:$8 sps:$4 sm:$0xff]  }
  0x73   :  { %1733 = vmatpush1.bf16.msra.mxu1 %v2728_v0  ;;  %v2812_v0 = vld [vmem:[%s3922_s1 + $0x2a0] ss:$8 sps:$4 sm:$0xff]  }
  0x74   :  { %1905 = vmatpush1.bf16.msra.mxu0 %v2731_v1  ;;  %1734 = vmatprep.subr.bf16.mxu1 %v2736_v2  ;;  %v2815_v1 = vld [vmem:[%s3922_s1 + $0x6a0] ss:$8 sps:$4 sm:$0xff]   ;;  %v2820_v2 = vld [vmem:[%s3922_s1 + $0x2b4] ss:$8 sps:$4 sm:$0xff]  }
  0x75   :  { %1906 = vmatprep.subr.bf16.mxu0 %v2739_v3  ;;  %v2823_v3 = vld [vmem:[%s3922_s1 + $0x6b4] ss:$8 sps:$4 sm:$0xff]  }
  0x77   :  { %1735 = vmatpush1.bf16.msra.mxu1 %v2734_v4  ;;  %v2818_v4 = vld [vmem:[%s3922_s1 + $0x2b0] ss:$8 sps:$4 sm:$0xff]  }
  0x78   :  { %1907 = vmatpush1.bf16.msra.mxu0 %v2737_v5  ;;  %1736 = vmatprep.subr.bf16.mxu1 %v2742_v6  ;;  %v2821_v5 = vld [vmem:[%s3922_s1 + $0x6b0] ss:$8 sps:$4 sm:$0xff]   ;;  %v2826_v6 = vld [vmem:[%s3922_s1 + $0x2c4] ss:$8 sps:$4 sm:$0xff]  }
  0x79   :  { %1908 = vmatprep.subr.bf16.mxu0 %v2745_v7  ;;  %v2829_v7 = vld [vmem:[%s3922_s1 + $0x6c4] ss:$8 sps:$4 sm:$0xff]  }
  0x7b   :  { %1737 = vmatpush1.bf16.msra.mxu1 %v2740_v8  ;;  %v2824_v8 = vld [vmem:[%s3922_s1 + $0x2c0] ss:$8 sps:$4 sm:$0xff]  }
  0x7c   :  { %1909 = vmatpush1.bf16.msra.mxu0 %v2743_v9  ;;  %1738 = vmatprep.subr.bf16.mxu1 %v2748_v10  ;;  %v2827_v9 = vld [vmem:[%s3922_s1 + $0x6c0] ss:$8 sps:$4 sm:$0xff]   ;;  %v2832_v10 = vld [vmem:[%s3922_s1 + $0x2d4] ss:$8 sps:$4 sm:$0xff]  }
  0x7d   :  { %1910 = vmatprep.subr.bf16.mxu0 %v2751_v11  ;;  %v2835_v11 = vld [vmem:[%s3922_s1 + $0x6d4] ss:$8 sps:$4 sm:$0xff]  }
  0x7f   :  { %1739 = vmatpush1.bf16.msra.mxu1 %v2746_v12  ;;  %v2830_v12 = vld [vmem:[%s3922_s1 + $0x2d0] ss:$8 sps:$4 sm:$0xff]  }
  0x80   :  { %1911 = vmatpush1.bf16.msra.mxu0 %v2749_v13  ;;  %1751 = vmatprep.subr.bf16.mxu1 %v2754_v14  ;;  %v2833_v13 = vld [vmem:[%s3922_s1 + $0x6d0] ss:$8 sps:$4 sm:$0xff]   ;;  %v2838_v14 = vld [vmem:[%s3922_s1 + $0x2e4] ss:$8 sps:$4 sm:$0xff]  }
  0x81   :  { %1923 = vmatprep.subr.bf16.mxu0 %v2757_v15  ;;  %v2841_v15 = vld [vmem:[%s3922_s1 + $0x6e4] ss:$8 sps:$4 sm:$0xff]  }
  0x82   :  { %1741 = vmatmul.mubr.bf16.vlgmr.msra.gmra.mrb[0].mxu1 %v2219_v16  ;;  %v2836_v16 = vld [vmem:[%s3922_s1 + $0x2e0] ss:$8 sps:$4 sm:$0xff]  }
  0x83   :  { %1913 = vmatmul.mubr.bf16.vlgmr.msra.gmra.mrb[0].mxu0 %v2227_v18  ;;  %1752 = vmatpush1.bf16.msra.mxu1 %v2752_v17  ;;  %v2839_v17 = vld [vmem:[%s3922_s1 + $0x6e0] ss:$8 sps:$4 sm:$0xff]   ;;  %v2844_v18 = vld [vmem:[%s3922_s1 + $0x2f4] ss:$8 sps:$4 sm:$0xff]  }
  0x84   :  { %1924 = vmatpush1.bf16.msra.mxu0 %v2755_v19  ;;  %1753 = vmatprep.subr.bf16.mxu1 %v2760_v20  ;;  %v2847_v19 = vld [vmem:[%s3922_s1 + $0x6f4] ss:$8 sps:$4 sm:$0xff]   ;;  %v2842_v20 = vld [vmem:[%s3922_s1 + $0x2f0] ss:$8 sps:$4 sm:$0xff]  }
  0x85   :  { %1925 = vmatprep.subr.bf16.mxu0 %v2763_v21  ;;  %1783 = vmatprep.mubr.bf16.mxu1 %v2222_v28  ;;  %v2845_v21 = vld [vmem:[%s3922_s1 + $0x6f0] ss:$8 sps:$4 sm:$0xff]   ;;  %v2229_v28 = vcombine.low %v3467_v29, %v3472_v30  ;;  %v2856_v29 = vld [vmem:[%s3922_s1 + $0x314] ss:$8 sps:$4 sm:$0xff]  }
  0x86   :  { %1955 = vmatprep.mubr.bf16.mxu0 %v2230_v31  ;;  %v3656_v31 = vld [vmem:[%s3923_s0 + $0x58] sm:$0xff] }
  0x87   :  { %1754 = vmatpush1.bf16.msra.mxu1 %v2758_v22  ;;  %v2850_v22 = vld [vmem:[%s3922_s1 + $0x304] ss:$8 sps:$4 sm:$0xff]   ;;  %v2859_v30 = vld [vmem:[%s3922_s1 + $0x714] ss:$8 sps:$4 sm:$0xff]  }
  0x88   :  { %1926 = vmatpush1.bf16.msra.mxu0 %v2761_v23  ;;  %1755 = vmatprep.subr.bf16.mxu1 %v2766_v26  ;;  %v2853_v23 = vld [vmem:[%s3922_s1 + $0x704] ss:$8 sps:$4 sm:$0xff]   ;;  %v3647_v26 = vld [vmem:[%s3923_s0 + $0x18] sm:$0xff] }
  0x89   :  { %1927 = vmatprep.subr.bf16.mxu0 %v2769_v27  ;;  %v2221_v27 = vcombine.low %v3449_v24, %v3454_v25  ;;  %v2848_v24 = vld [vmem:[%s3922_s1 + $0x300] ss:$8 sps:$4 sm:$0xff]  }
  0x8a   :  { %v2851_v25 = vld [vmem:[%s3922_s1 + $0x700] ss:$8 sps:$4 sm:$0xff]  }
  0x8b   :  { %1756 = vmatpush1.bf16.msra.mxu1 %v2764_v32  ;;  %v3661_v32 = vld [vmem:[%s3923_s0 + $0x38] sm:$0xff] }
  0x8c   :  { %1928 = vmatpush1.bf16.msra.mxu0 %v2767_v33  ;;  %1757 = vmatprep.subr.bf16.mxu1 %v2772_v34  ;;  %v3666_v33 = vld [vmem:[%s3923_s0 + $0x78] sm:$0xff]  ;;  %v2224_v34 = vcombine.high %v3647_v26, %v3656_v31 }
  0x8d   :  { %1929 = vmatprep.subr.bf16.mxu0 %v2775_v35  ;;  %v2232_v35 = vcombine.high %v3661_v32, %v3666_v33 }
  0x8f   :  { %1758 = vmatpush1.bf16.msra.mxu1 %v2770_v36  ;;  %v2854_v36 = vld [vmem:[%s3922_s1 + $0x310] ss:$8 sps:$4 sm:$0xff]  }
  0x90   :  { %1930 = vmatpush1.bf16.msra.mxu0 %v2773_v37  ;;  %1759 = vmatprep.subr.bf16.mxu1 %v2778_v38  ;;  %v2857_v37 = vld [vmem:[%s3922_s1 + $0x710] ss:$8 sps:$4 sm:$0xff]   ;;  %v2862_v38 = vld [vmem:[%s3922_s1 + $0x324] ss:$8 sps:$4 sm:$0xff]  }
  0x91   :  { %1931 = vmatprep.subr.bf16.mxu0 %v2781_v39  ;;  %v2865_v39 = vld [vmem:[%s3922_s1 + $0x724] ss:$8 sps:$4 sm:$0xff]  }
  0x93   :  { %1760 = vmatpush1.bf16.msra.mxu1 %v2776_v40  ;;  %v2860_v40 = vld [vmem:[%s3922_s1 + $0x320] ss:$8 sps:$4 sm:$0xff]  }
  0x94   :  { %1932 = vmatpush1.bf16.msra.mxu0 %v2779_v41  ;;  %1761 = vmatprep.subr.bf16.mxu1 %v2784_v42  ;;  %v2863_v41 = vld [vmem:[%s3922_s1 + $0x720] ss:$8 sps:$4 sm:$0xff]   ;;  %v2868_v42 = vld [vmem:[%s3922_s1 + $0x334] ss:$8 sps:$4 sm:$0xff]  }
  0x95   :  { %1933 = vmatprep.subr.bf16.mxu0 %v2787_v43  ;;  %v2871_v43 = vld [vmem:[%s3922_s1 + $0x734] ss:$8 sps:$4 sm:$0xff]  }
  0x97   :  { %1762 = vmatpush1.bf16.msra.mxu1 %v2782_v44  ;;  %v2866_v44 = vld [vmem:[%s3922_s1 + $0x330] ss:$8 sps:$4 sm:$0xff]  }
  0x98   :  { %1934 = vmatpush1.bf16.msra.mxu0 %v2785_v45  ;;  %1763 = vmatprep.subr.bf16.mxu1 %v2790_v46  ;;  %v2869_v45 = vld [vmem:[%s3922_s1 + $0x730] ss:$8 sps:$4 sm:$0xff]   ;;  %v2874_v46 = vld [vmem:[%s3922_s1 + $0x344] ss:$8 sps:$4 sm:$0xff]  }
  0x99   :  { %1935 = vmatprep.subr.bf16.mxu0 %v2793_v47  ;;  %v2877_v47 = vld [vmem:[%s3922_s1 + $0x744] ss:$8 sps:$4 sm:$0xff]  }
  0x9b   :  { %1764 = vmatpush1.bf16.msra.mxu1 %v2788_v48  ;;  %v2872_v48 = vld [vmem:[%s3922_s1 + $0x340] ss:$8 sps:$4 sm:$0xff]  }
  0x9c   :  { %1936 = vmatpush1.bf16.msra.mxu0 %v2791_v49  ;;  %1765 = vmatprep.subr.bf16.mxu1 %v2796_v50  ;;  %v2875_v49 = vld [vmem:[%s3922_s1 + $0x740] ss:$8 sps:$4 sm:$0xff]   ;;  %v2880_v50 = vld [vmem:[%s3922_s1 + $0x354] ss:$8 sps:$4 sm:$0xff]  }
  0x9d   :  { %1937 = vmatprep.subr.bf16.mxu0 %v2799_v51  ;;  %v2883_v51 = vld [vmem:[%s3922_s1 + $0x754] ss:$8 sps:$4 sm:$0xff]  }
  0x9f   :  { %1766 = vmatpush1.bf16.msra.mxu1 %v2794_v52  ;;  %v2878_v52 = vld [vmem:[%s3922_s1 + $0x350] ss:$8 sps:$4 sm:$0xff]  }
  0xa0   :  { %1938 = vmatpush1.bf16.msra.mxu0 %v2797_v53  ;;  %1767 = vmatprep.subr.bf16.mxu1 %v2802_v54  ;;  %v2881_v53 = vld [vmem:[%s3922_s1 + $0x750] ss:$8 sps:$4 sm:$0xff]   ;;  %v2886_v54 = vld [vmem:[%s3922_s1 + $0x364] ss:$8 sps:$4 sm:$0xff]  }
  0xa1   :  { %1939 = vmatprep.subr.bf16.mxu0 %v2805_v55  ;;  %v2889_v55 = vld [vmem:[%s3922_s1 + $0x764] ss:$8 sps:$4 sm:$0xff]  }
  0xa3   :  { %1768 = vmatpush1.bf16.msra.mxu1 %v2800_v56  ;;  %v2884_v56 = vld [vmem:[%s3922_s1 + $0x360] ss:$8 sps:$4 sm:$0xff]  }
  0xa4   :  { %1940 = vmatpush1.bf16.msra.mxu0 %v2803_v57  ;;  %1769 = vmatprep.subr.bf16.mxu1 %v2808_v58  ;;  %v2887_v57 = vld [vmem:[%s3922_s1 + $0x760] ss:$8 sps:$4 sm:$0xff]   ;;  %v2892_v58 = vld [vmem:[%s3922_s1 + $0x374] ss:$8 sps:$4 sm:$0xff]  }
  0xa5   :  { %1941 = vmatprep.subr.bf16.mxu0 %v2811_v59  ;;  %v2895_v59 = vld [vmem:[%s3922_s1 + $0x774] ss:$8 sps:$4 sm:$0xff]  }
  0xa7   :  { %1770 = vmatpush1.bf16.msra.mxu1 %v2806_v60  ;;  %v2890_v60 = vld [vmem:[%s3922_s1 + $0x370] ss:$8 sps:$4 sm:$0xff]  }
  0xa8   :  { %1942 = vmatpush1.bf16.msra.mxu0 %v2809_v61  ;;  %1771 = vmatprep.subr.bf16.mxu1 %v2814_v62  ;;  %v2893_v61 = vld [vmem:[%s3922_s1 + $0x770] ss:$8 sps:$4 sm:$0xff]   ;;  %v2898_v62 = vld [vmem:[%s3922_s1 + $0x384] ss:$8 sps:$4 sm:$0xff]  }
  0xa9   :  { %1943 = vmatprep.subr.bf16.mxu0 %v2817_v63  ;;  %v2901_v63 = vld [vmem:[%s3922_s1 + $0x784] ss:$8 sps:$4 sm:$0xff]  }
  0xab   :  { %1772 = vmatpush1.bf16.msra.mxu1 %v2812_v0  ;;  %v2896_v0 = vld [vmem:[%s3922_s1 + $0x380] ss:$8 sps:$4 sm:$0xff]  }
  0xac   :  { %1944 = vmatpush1.bf16.msra.mxu0 %v2815_v1  ;;  %1773 = vmatprep.subr.bf16.mxu1 %v2820_v2  ;;  %v2899_v1 = vld [vmem:[%s3922_s1 + $0x780] ss:$8 sps:$4 sm:$0xff]   ;;  %v2904_v2 = vld [vmem:[%s3922_s1 + $0x394] ss:$8 sps:$4 sm:$0xff]  }
  0xad   :  { %1945 = vmatprep.subr.bf16.mxu0 %v2823_v3  ;;  %v2907_v3 = vld [vmem:[%s3922_s1 + $0x794] ss:$8 sps:$4 sm:$0xff]  }
  0xaf   :  { %1774 = vmatpush1.bf16.msra.mxu1 %v2818_v4  ;;  %v2902_v4 = vld [vmem:[%s3922_s1 + $0x390] ss:$8 sps:$4 sm:$0xff]  }
  0xb0   :  { %1946 = vmatpush1.bf16.msra.mxu0 %v2821_v5  ;;  %1775 = vmatprep.subr.bf16.mxu1 %v2826_v6  ;;  %v2905_v5 = vld [vmem:[%s3922_s1 + $0x790] ss:$8 sps:$4 sm:$0xff]   ;;  %v2910_v6 = vld [vmem:[%s3922_s1 + $0x3a4] ss:$8 sps:$4 sm:$0xff]  }
  0xb1   :  { %1947 = vmatprep.subr.bf16.mxu0 %v2829_v7  ;;  %v2913_v7 = vld [vmem:[%s3922_s1 + $0x7a4] ss:$8 sps:$4 sm:$0xff]  }
  0xb3   :  { %1776 = vmatpush1.bf16.msra.mxu1 %v2824_v8  ;;  %v2908_v8 = vld [vmem:[%s3922_s1 + $0x3a0] ss:$8 sps:$4 sm:$0xff]  }
  0xb4   :  { %1948 = vmatpush1.bf16.msra.mxu0 %v2827_v9  ;;  %1777 = vmatprep.subr.bf16.mxu1 %v2832_v10  ;;  %v2911_v9 = vld [vmem:[%s3922_s1 + $0x7a0] ss:$8 sps:$4 sm:$0xff]   ;;  %v2916_v10 = vld [vmem:[%s3922_s1 + $0x3b4] ss:$8 sps:$4 sm:$0xff]  }
  0xb5   :  { %1949 = vmatprep.subr.bf16.mxu0 %v2835_v11  ;;  %v2919_v11 = vld [vmem:[%s3922_s1 + $0x7b4] ss:$8 sps:$4 sm:$0xff]  }
  0xb7   :  { %1778 = vmatpush1.bf16.msra.mxu1 %v2830_v12  ;;  %v2914_v12 = vld [vmem:[%s3922_s1 + $0x3b0] ss:$8 sps:$4 sm:$0xff]  }
  0xb8   :  { %1950 = vmatpush1.bf16.msra.mxu0 %v2833_v13  ;;  %1779 = vmatprep.subr.bf16.mxu1 %v2838_v14  ;;  %v2917_v13 = vld [vmem:[%s3922_s1 + $0x7b0] ss:$8 sps:$4 sm:$0xff]   ;;  %v2922_v14 = vld [vmem:[%s3922_s1 + $0x3c4] ss:$8 sps:$4 sm:$0xff]  }
  0xb9   :  { %1951 = vmatprep.subr.bf16.mxu0 %v2841_v15  ;;  %v2925_v15 = vld [vmem:[%s3922_s1 + $0x7c4] ss:$8 sps:$4 sm:$0xff]  }
  0xbb   :  { %1780 = vmatpush1.bf16.msra.mxu1 %v2836_v16  ;;  %v2920_v16 = vld [vmem:[%s3922_s1 + $0x3c0] ss:$8 sps:$4 sm:$0xff]  }
  0xbc   :  { %1952 = vmatpush1.bf16.msra.mxu0 %v2839_v17  ;;  %1781 = vmatprep.subr.bf16.mxu1 %v2844_v18  ;;  %v2923_v17 = vld [vmem:[%s3922_s1 + $0x7c0] ss:$8 sps:$4 sm:$0xff]   ;;  %v2928_v18 = vld [vmem:[%s3922_s1 + $0x3d4] ss:$8 sps:$4 sm:$0xff]  }
  0xbd   :  { %1953 = vmatprep.subr.bf16.mxu0 %v2847_v19  ;;  %v2931_v19 = vld [vmem:[%s3922_s1 + $0x7d4] ss:$8 sps:$4 sm:$0xff]  }
  0xbf   :  { %1782 = vmatpush1.bf16.msra.mxu1 %v2842_v20  ;;  %v2926_v20 = vld [vmem:[%s3922_s1 + $0x3d0] ss:$8 sps:$4 sm:$0xff]  }
  0xc0   :  { %1954 = vmatpush1.bf16.msra.mxu0 %v2845_v21  ;;  %1794 = vmatprep.subr.bf16.mxu1 %v2850_v22  ;;  %v2929_v21 = vld [vmem:[%s3922_s1 + $0x7d0] ss:$8 sps:$4 sm:$0xff]   ;;  %v2934_v22 = vld [vmem:[%s3922_s1 + $0x3e4] ss:$8 sps:$4 sm:$0xff]  }
  0xc1   :  { %1966 = vmatprep.subr.bf16.mxu0 %v2853_v23  ;;  %v2937_v23 = vld [vmem:[%s3922_s1 + $0x7e4] ss:$8 sps:$4 sm:$0xff]  }
  0xc2   :  { %1784 = vmatmul.mubr.bf16.vlgmr.msra.gmra.mrb[0].mxu1 %v2221_v27  ;;  %v2932_v27 = vld [vmem:[%s3922_s1 + $0x3e0] ss:$8 sps:$4 sm:$0xff]  }
  0xc3   :  { %1956 = vmatmul.mubr.bf16.vlgmr.msra.gmra.mrb[0].mxu0 %v2229_v28  ;;  %1795 = vmatpush1.bf16.msra.mxu1 %v2848_v24  ;;  %v2935_v28 = vld [vmem:[%s3922_s1 + $0x7e0] ss:$8 sps:$4 sm:$0xff]   ;;  %v2940_v24 = vld [vmem:[%s3922_s1 + $0x3f4] ss:$8 sps:$4 sm:$0xff]  }
  0xc4   :  { %1967 = vmatpush1.bf16.msra.mxu0 %v2851_v25  ;;  %1796 = vmatprep.subr.bf16.mxu1 %v2856_v29  ;;  %v2943_v25 = vld [vmem:[%s3922_s1 + $0x7f4] ss:$8 sps:$4 sm:$0xff]   ;;  %v2938_v29 = vld [vmem:[%s3922_s1 + $0x3f0] ss:$8 sps:$4 sm:$0xff]  }
  0xc5   :  { %1968 = vmatprep.subr.bf16.mxu0 %v2859_v30  ;;  %1826 = vmatprep.mubr.bf16.mxu1 %v2224_v34  ;;  %v2941_v30 = vld [vmem:[%s3922_s1 + $0x7f0] ss:$8 sps:$4 sm:$0xff]   ;;  %v2944_v34 = vld [vmem:[%s3924_s3 + $0x40] sm:$0xff]  }
  0xc6   :  { %1998 = vmatprep.mubr.bf16.mxu0 %v2232_v35  ;;  %v2223_v35 = vcombine.low %v3647_v26, %v3656_v31  ;;  %v2947_v26 = vld [vmem:[%s3924_s3 + $0x8] sm:$0xff]   ;;  %v2948_v31 = vld [vmem:[%s3924_s3 + $0x50] sm:$0xff]  }
  0xc7   :  { %1797 = vmatpush1.bf16.msra.mxu1 %v2854_v36  ;;  %v2231_v36 = vcombine.low %v3661_v32, %v3666_v33  ;;  %v2949_v32 = vld [vmem:[%s3924_s3 + $0x10] sm:$0xff]   ;;  %v2950_v33 = vld [vmem:[%s3924_s3 + $0x58] sm:$0xff]  }
  0xc8   :  { %1969 = vmatpush1.bf16.msra.mxu0 %v2857_v37  ;;  %1798 = vmatprep.subr.bf16.mxu1 %v2862_v38  ;;  %v2945_v37 = vld [vmem:[%s3924_s3] sm:$0xff]   ;;  %v2946_v38 = vld [vmem:[%s3924_s3 + $0x48] sm:$0xff]  }
  0xc9   :  { %1970 = vmatprep.subr.bf16.mxu0 %v2865_v39  ;;  %v2951_v39 = vld [vmem:[%s3924_s3 + $0x18] sm:$0xff]  }
  0xcb   :  { %1799 = vmatpush1.bf16.msra.mxu1 %v2860_v40  ;;  %v2952_v40 = vld [vmem:[%s3924_s3 + $0x60] sm:$0xff]  }
  0xcc   :  { %1971 = vmatpush1.bf16.msra.mxu0 %v2863_v41  ;;  %1800 = vmatprep.subr.bf16.mxu1 %v2868_v42  ;;  %v2953_v41 = vld [vmem:[%s3924_s3 + $0x20] sm:$0xff]   ;;  %v2954_v42 = vld [vmem:[%s3924_s3 + $0x68] sm:$0xff]  }
  0xcd   :  { %1972 = vmatprep.subr.bf16.mxu0 %v2871_v43  ;;  %v2955_v43 = vld [vmem:[%s3924_s3 + $0x28] sm:$0xff]  }
  0xcf   :  { %1801 = vmatpush1.bf16.msra.mxu1 %v2866_v44  ;;  %v2956_v44 = vld [vmem:[%s3924_s3 + $0x70] sm:$0xff]  }
  0xd0   :  { %1973 = vmatpush1.bf16.msra.mxu0 %v2869_v45  ;;  %1802 = vmatprep.subr.bf16.mxu1 %v2874_v46  ;;  %v2957_v45 = vld [vmem:[%s3924_s3 + $0x30] sm:$0xff]   ;;  %v2958_v46 = vld [vmem:[%s3924_s3 + $0x78] sm:$0xff]  }
  0xd1   :  { %1974 = vmatprep.subr.bf16.mxu0 %v2877_v47  ;;  %v2959_v47 = vld [vmem:[%s3924_s3 + $0x38] sm:$0xff]  }
  0xd3   :  { %1803 = vmatpush1.bf16.msra.mxu1 %v2872_v48  ;;  %v295_v48 = vlaneseq }
  0xd4   :  { %1975 = vmatpush1.bf16.msra.mxu0 %v2875_v49  ;;  %1804 = vmatprep.subr.bf16.mxu1 %v2880_v50 }
  0xd5   :  { %1976 = vmatprep.subr.bf16.mxu0 %v2883_v51  ;;  %v296_v49 = vshrl.u32 %v295_v48, 7  ;;  %v293_v51 = vld [vmem:[%s3925_s2] sm:$0x3] }
  0xd7   :  { %1805 = vmatpush1.bf16.msra.mxu1 %v2878_v52  ;;  %v297_v50 = vsub.s32 0, %v296_v49  ;;  %v301_v52 = vsub.s32 1, %v296_v49 }
  0xd8   :  { %1977 = vmatpush1.bf16.msra.mxu0 %v2881_v53  ;;  %1806 = vmatprep.subr.bf16.mxu1 %v2886_v54 }
  0xd9   :  { %1978 = vmatprep.subr.bf16.mxu0 %v2889_v55  ;;  %v298_v53 = vrot.slane %v293_v51, %v297_v50  ;;  %v302_v54 = vrot.slane %v293_v51, %v301_v52 }
  0xdb   :  { %1807 = vmatpush1.bf16.msra.mxu1 %v2884_v56 }
  0xdc   :  { %1979 = vmatpush1.bf16.msra.mxu0 %v2887_v57  ;;  %1808 = vmatprep.subr.bf16.mxu1 %v2892_v58 }
  0xdd   :  { %1980 = vmatprep.subr.bf16.mxu0 %v2895_v59 }
  0xdf   :  { %1809 = vmatpush1.bf16.msra.mxu1 %v2890_v60 }
  0xe0   :  { %1981 = vmatpush1.bf16.msra.mxu0 %v2893_v61  ;;  %1810 = vmatprep.subr.bf16.mxu1 %v2898_v62 }
  0xe1   :  { %1982 = vmatprep.subr.bf16.mxu0 %v2901_v63 }
  0xe3   :  { %1811 = vmatpush1.bf16.msra.mxu1 %v2896_v0 }
  0xe4   :  { %1983 = vmatpush1.bf16.msra.mxu0 %v2899_v1  ;;  %1812 = vmatprep.subr.bf16.mxu1 %v2904_v2 }
  0xe5   :  { %1984 = vmatprep.subr.bf16.mxu0 %v2907_v3 }
  0xe7   :  { %1813 = vmatpush1.bf16.msra.mxu1 %v2902_v4 }
  0xe8   :  { %1985 = vmatpush1.bf16.msra.mxu0 %v2905_v5  ;;  %1814 = vmatprep.subr.bf16.mxu1 %v2910_v6 }
  0xe9   :  { %1986 = vmatprep.subr.bf16.mxu0 %v2913_v7 }
  0xeb   :  { %1815 = vmatpush1.bf16.msra.mxu1 %v2908_v8 }
  0xec   :  { %1987 = vmatpush1.bf16.msra.mxu0 %v2911_v9  ;;  %1816 = vmatprep.subr.bf16.mxu1 %v2916_v10 }
  0xed   :  { %1988 = vmatprep.subr.bf16.mxu0 %v2919_v11 }
  0xef   :  { %1817 = vmatpush1.bf16.msra.mxu1 %v2914_v12 }
  0xf0   :  { %1989 = vmatpush1.bf16.msra.mxu0 %v2917_v13  ;;  %1818 = vmatprep.subr.bf16.mxu1 %v2922_v14 }
  0xf1   :  { %1990 = vmatprep.subr.bf16.mxu0 %v2925_v15  ;;  %v2489_v15 = vld [vmem:[%s3926_s4] ss:$0 sm:$0xff] }
  0xf3   :  { %1819 = vmatpush1.bf16.msra.mxu1 %v2920_v16 }
  0xf4   :  { %1991 = vmatpush1.bf16.msra.mxu0 %v2923_v17  ;;  %1820 = vmatprep.subr.bf16.mxu1 %v2928_v18 }
  0xf5   :  { %1992 = vmatprep.subr.bf16.mxu0 %v2931_v19 }
  0xf7   :  { %1821 = vmatpush1.bf16.msra.mxu1 %v2926_v20 }
  0xf8   :  { %1993 = vmatpush1.bf16.msra.mxu0 %v2929_v21  ;;  %1822 = vmatprep.subr.bf16.mxu1 %v2934_v22 }
  0xf9   :  { %1994 = vmatprep.subr.bf16.mxu0 %v2937_v23 }
  0xfb   :  { %1823 = vmatpush1.bf16.msra.mxu1 %v2932_v27 }
  0xfc   :  { %1995 = vmatpush1.bf16.msra.mxu0 %v2935_v28  ;;  %1824 = vmatprep.subr.bf16.mxu1 %v2940_v24 }
  0xfd   :  { %1996 = vmatprep.subr.bf16.mxu0 %v2943_v25 }
  0xff   :  { %1825 = vmatpush1.bf16.msra.mxu1 %v2938_v29 }
 0x100   :  { %1997 = vmatpush1.bf16.msra.mxu0 %v2941_v30  ;;  %2506 = vmatprep.subr.bf16.mxu1 %v2944_v34 }
 0x102   :  { %1827 = vmatmul.mubr.bf16.vlgmr.msra.gmra.mrb[0].mxu1 %v2223_v35 }
 0x103   :  { %1999 = vmatmul.mubr.bf16.vlgmr.msra.gmra.mrb[0].mxu0 %v2231_v36  ;;  %2507 = vmatpush3.bf16.msra.mxu1 %v2945_v37 }
 0x104   :  { %2508 = vmatprep.subr.bf16.mxu1 %v2946_v38 }
 0x107   :  { %2509 = vmatpush3.bf16.msra.mxu1 %v2947_v26 }
 0x108   :  { %2510 = vmatprep.subr.bf16.mxu1 %v2948_v31 }
 0x10b   :  { %2511 = vmatpush3.bf16.msra.mxu1 %v2949_v32 }
 0x10c   :  { %2512 = vmatprep.subr.bf16.mxu1 %v2950_v33 }
 0x10f   :  { %2513 = vmatpush3.bf16.msra.mxu1 %v2951_v39 }
 0x110   :  { %2514 = vmatprep.subr.bf16.mxu1 %v2952_v40 }
 0x113   :  { %2515 = vmatpush3.bf16.msra.mxu1 %v2953_v41 }
 0x114   :  { %2516 = vmatprep.subr.bf16.mxu1 %v2954_v42 }
 0x117   :  { %2517 = vmatpush3.bf16.msra.mxu1 %v2955_v43 }
 0x118   :  { %2518 = vmatprep.subr.bf16.mxu1 %v2956_v44 }
 0x11b   :  { %2519 = vmatpush3.bf16.msra.mxu1 %v2957_v45 }
 0x11c   :  { %2520 = vmatprep.subr.bf16.mxu1 %v2958_v46 }
 0x11f   :  { %2521 = vmatpush3.bf16.msra.mxu1 %v2959_v47 }
 0x1d5   :  { %v1828_v55 = vpop.f32.mrb[0].mxu1 }
 0x1d6   :  { %v2000_v56 = vpop.f32.mrb[0].mxu0  ;;  %v2528_v57 = vadd.f32 %v1828_v55, %v298_v53  ;;  %v1830_v58 = vpop.f32.mrb[1].mxu1 }
 0x1d7   :  { %v2002_v59 = vpop.f32.mrb[1].mxu0  ;;  %v2530_v60 = vadd.f32 %v1830_v58, %v302_v54  ;;  %v1832_v61 = vpop.f32.mrb[2].mxu1 }
 0x1d8   :  { %v2004_v62 = vpop.f32.mrb[2].mxu0  ;;  %v2529_v63 = vadd.f32 %v2528_v57, %v2000_v56  ;;  %v2532_v0 = vadd.f32 %v1832_v61, %v298_v53  ;;  %v1834_v1 = vpop.f32.mrb[3].mxu1 }
 0x1d9   :  { %v2006_v2 = vpop.f32.mrb[3].mxu0  ;;  %v2531_v3 = vadd.f32 %v2530_v60, %v2002_v59  ;;  %v2534_v4 = vadd.f32 %v1834_v1, %v302_v54 }
 0x1da   :  { %v2533_v5 = vadd.f32 %v2532_v0, %v2004_v62  ;;  %v2009_v7 = vmax.f32 %v2529_v63, 0.0 }
 0x1db   :  { %v2535_v6 = vadd.f32 %v2534_v4, %v2006_v2  ;;  %v2010_v9 = vmax.f32 %v2531_v3, 0.0 }
 0x1dc   :  { %v2011_v8 = vmax.f32 %v2533_v5, 0.0 }
 0x1dd   :  { %v2012_v10 = vmax.f32 %v2535_v6, 0.0 }
 0x1de   :  { %v2013_v11 = vpack.c.bf16 %v2011_v8, %v2009_v7 }
 0x1df   :  { %v2014_v12 = vpack.c.bf16 %v2012_v10, %v2010_v9 }
 0x1e1   :  { %2182 = vmatprep.mubr.bf16.mxu1 %v2014_v12 }
 0x1e2   :  { %2183 = vmatmul.mubr.bf16.vlgmr.msra.gmra.mrb[4].mxu1 %v2013_v11 }
 0x2b5   :  { %v2522_v13 = vpop.f32.mrb[4].mxu1 }
 0x2b6   :  { %v2523_v14 = vpop.f32.mrb[5].mxu1 }
 0x2b7   :  { %v2524_v16 = vadd.f32 %v2523_v14, %v2522_v13  ;;  %v2525_v17 = vpop.f32.mrb[6].mxu1 }
 0x2b8   :  { %v2526_v18 = vpop.f32.mrb[7].mxu1 }
 0x2b9   :  { %v2527_v19 = vadd.f32 %v2526_v18, %v2525_v17  ;;  %v2185_v20 = vadd.f32 %v2524_v16, %v2489_v15 }
 0x2bb   :  { %2191 = vmax.xlane.f32.xlu0 %v2185_v20  ;;  %v2188_v21 = vadd.f32 %v2527_v19, %v2489_v15 }
 0x2bf   :  { %2193 = vmax.xlane.f32.xlu0 %v2188_v21 }
 0x348   :  { %v2192_v22 = vpop.xlane.xlu0 %2191 }
 0x349   :  { %v2195_v23 = vsub.f32 %v2185_v20, %v2192_v22 }
 0x34b   :  { %v2197_v27 = vmul.f32 1.442695, %v2195_v23 }
 0x34c   :  { %v2194_v28 = vpop.xlane.xlu0 %2193 }
 0x34d   :  { %v2196_v24 = vsub.f32 %v2188_v21, %v2194_v28  ;;  %2960 = vpow2.f32 %v2197_v27 }
 0x34f   :  { %v2199_v25 = vmul.f32 1.442695, %v2196_v24 }
 0x351   :  { %2962 = vpow2.f32 %v2199_v25 }
 0x357   :  { %v2961_v29 = vpop.eup %2960 }
 0x358   :  { %2201 = vadd.xlane.f32.xlu1 %v2961_v29 }
 0x35b   :  { %v2963_v30 = vpop.eup %2962 }
 0x35c   :  { %2203 = vadd.xlane.f32.xlu1 %v2963_v30 }
 0x3e5   :  { %v2202_v34 = vpop.xlane.xlu1 %2201 }
 0x3e6   :  { %2964 = vlog2.f32 %v2202_v34 }
 0x3e9   :  { %v2204_v35 = vpop.xlane.xlu1 %2203 }
 0x3ea   :  { %2966 = vlog2.f32 %v2204_v35 }
 0x3f0   :  { %v2965_v36 = vpop.eup %2964 }
 0x3f1   :  { %v2206_v37 = vmul.f32 0.6931472, %v2965_v36 }
 0x3f3   :  { %v2209_v38 = vsub.f32 %v2195_v23, %v2206_v37 }
 0x3f4   :  { %v2967_v26 = vpop.eup %2966 }
 0x3f5   :  { %2211 = vst [vmem:[%s3927_s5] sm:$0xff] %v2209_v38  ;;  %v2208_v31 = vmul.f32 0.6931472, %v2967_v26 }
 0x3f7   :  { %v2210_v32 = vsub.f32 %v2196_v24, %v2208_v31 }
 0x3f9   :  { %2212 = vst [vmem:[%s3927_s5 + $0x8] sm:$0xff] %v2210_v32 }

</bundles_post_ra>
